<compile_context>
chip_gen: v7x
topology: tpu7x:2x2x1
jax: 0.10.0
libtpu: 0.0.40
codegen_flags: <defaults>
</compile_context>

<pallas_src>
import math
from typing import Dict, List

import jax
import jax.numpy as jnp
from jax.experimental import pallas as pl
from jax.experimental.pallas import tpu as pltpu

_LANES = 128
_SUBLANES = 8
# Leading "parallel" grid axis: splits the row range across the 2 TensorCores
# on v7x; on single-TC v5e/v6e it is just a 2-long sequential outer loop.
_NUM_SPLITS = 2


def _cdiv(a: int, b: int) -> int:
    return -(-a // b)


def _lcm(a: int, b: int) -> int:
    return a * b // math.gcd(a, b)


# ----------------------------------------------------------------------------
# Pallas kernel: fused weighted-MSE partial reduction
# ----------------------------------------------------------------------------
def _wmse_kernel(pred_ref, gt_ref, w_ref, out_ref, acc_ref):
    # pred_ref, gt_ref : VMEM (tile_rows, 128) blocks of the lane-dense flat
    #                    prediction / ground-truth window (native dtype).
    # w_ref            : VMEM (tile_rows, 128) resident pre-scaled weight block
    #                    (weight[target] / (B*P) per element).
    # out_ref          : VMEM (8, 128) per-split partial sums.
    # acc_ref          : VMEM (8, 128) f32 scratch accumulator.
    i = pl.program_id(1)

    @pl.when(i == 0)
    def _init():
        acc_ref[...] = jnp.zeros_like(acc_ref)

    d = pred_ref[...].astype(jnp.float32) - gt_ref[...].astype(jnp.float32)
    contrib = d * d * w_ref[...]
    # (tile_rows, 128) -> (tile_rows/8, 8, 128) and sum over groups of 8 rows:
    # each addend is a whole vreg, so this is pure element-wise VALU work.
    acc_ref[...] += jnp.sum(contrib.reshape(-1, _SUBLANES, _LANES), axis=0)

    @pl.when(i == pl.num_programs(1) - 1)
    def _finalize():
        out_ref[...] = acc_ref[...]


def _weighted_mse(pred: jnp.ndarray, gt: jnp.ndarray, weights: jnp.ndarray,
                  *, max_tile_rows: int = 1024) -> jnp.ndarray:
    """sum_t weights[t] * mean_{b,p}((pred[..., t] - gt[..., t])^2).

    pred, gt: (B, P, NT) loss-window arrays (any float dtype), weights: (NT,).
    max_tile_rows=1024 -> <=512 KiB f32 per streamed block; with 2 inputs x 2
    pipeline buffers + resident weight block this stays ~3 MiB of VMEM, safe on
    v5e (16 MiB scoped default), v6e and v7x (64 MiB physical).
    """
    b, p, nt = gt.shape
    n_elems = b * p * nt

    # Fold the global mean divisor into the weights (kernel is tiled, so the
    # divisor must be the global B*P, not the block row count).
    w_scaled = jnp.asarray(weights, jnp.float32) * (1.0 / (b * p))

    # Lane-dense flat layout. The per-element weight pattern has period NT on
    # the flat axis; choose tile_rows so tile_rows*128 is a multiple of NT (and
    # of 8 for sublane alignment) -> one (tile_rows, 128) weight block is valid
    # for every tile.
    rows_real = _cdiv(n_elems, _LANES)
    row_period = _lcm(nt, _LANES) // _LANES
    row_step = _lcm(_SUBLANES, row_period)
    tile_rows = _cdiv(rows_real, row_step) * row_step
    if tile_rows > max_tile_rows:
        tile_rows = _cdiv(max_tile_rows, row_step) * row_step
    tile_elems = tile_rows * _LANES  # multiple of NT by construction

    steps = _cdiv(_cdiv(rows_real, tile_rows), _NUM_SPLITS)  # per split
    total_rows = _NUM_SPLITS * steps * tile_rows
    total_elems = total_rows * _LANES

    # TODO(synk): the window slice + pad still materializes one window-sized
    # copy in HBM; folding it into index_map offsets would trade away the
    # lane-dense layout (NT is typically << 128), so the copy is kept.
    def _flat_pad(x):
        x = x.reshape(-1)                      # free view: targets fastest axis
        pad = total_elems - n_elems
        if pad:
            x = jnp.pad(x, (0, pad))           # zero pad -> diff 0 -> no effect
        return x.reshape(total_rows, _LANES)

    pred2d = _flat_pad(pred)                   # native dtype; cast in kernel
    gt2d = _flat_pad(gt)
    w2d = jnp.tile(w_scaled, tile_elems // nt).reshape(tile_rows, _LANES)

    partial = pl.pallas_call(
        _wmse_kernel,
        out_shape=jax.ShapeDtypeStruct((_NUM_SPLITS * _SUBLANES, _LANES),
                                       jnp.float32),
        grid=(_NUM_SPLITS, steps),
        in_specs=[
            pl.BlockSpec((tile_rows, _LANES), lambda c, i: (c * steps + i, 0)),
            pl.BlockSpec((tile_rows, _LANES), lambda c, i: (c * steps + i, 0)),
            pl.BlockSpec((tile_rows, _LANES), lambda c, i: (0, 0)),  # resident
        ],
        out_specs=pl.BlockSpec((_SUBLANES, _LANES), lambda c, i: (c, 0)),
        scratch_shapes=[pltpu.VMEM((_SUBLANES, _LANES), jnp.float32)],
        compiler_params=pltpu.CompilerParams(
            dimension_semantics=("parallel", "arbitrary")),
    )(pred2d, gt2d, w2d)

    # Tiny (2*8, 128) -> scalar reduction of per-split / per-lane partials.
    return jnp.sum(partial)


# ----------------------------------------------------------------------------
# Minimal Config + BaseLoss port (glue in plain JAX, reduction in Pallas)
# ----------------------------------------------------------------------------
class Config:
    def __init__(self, predict_last_n, target_variables,
                 target_loss_weights=None, no_loss_frequencies=()):
        self.predict_last_n = predict_last_n
        self.target_variables = target_variables
        self.target_loss_weights = target_loss_weights
        self.no_loss_frequencies = list(no_loss_frequencies)


def _get_predict_last_n(cfg: Config) -> dict:
    predict_last_n = cfg.predict_last_n
    if isinstance(predict_last_n, int):
        predict_last_n = {'': predict_last_n}
    if len(predict_last_n) == 1:
        predict_last_n = {'': list(predict_last_n.values())[0]}
    return predict_last_n


class BaseLoss:
    """JAX/Pallas port of BaseLoss with a concrete per-target MSE `_get_loss`.

    # TODO(synk): `_get_loss` is abstract in the original module; per-target
    # MSE (output_size_per_target=1) is the synthetic concrete instantiation.
    # TODO(synk): the original concrete losses usually mask NaNs in the ground
    # truth (MaskedMSE-style); NaNs would propagate here.
    """

    def __init__(self, cfg: Config, prediction_keys: List[str],
                 ground_truth_keys: List[str], additional_data: List[str] = None,
                 output_size_per_target: int = 1):
        self._predict_last_n = _get_predict_last_n(cfg)
        self._frequencies = [f for f in self._predict_last_n.keys()
                             if f not in cfg.no_loss_frequencies]
        self._output_size_per_target = output_size_per_target
        self._regularization_terms = []
        self._prediction_keys = prediction_keys
        self._ground_truth_keys = ground_truth_keys
        self._additional_data = additional_data or []

        if cfg.target_loss_weights is None:
            nt = len(cfg.target_variables)
            weights = jnp.full((nt,), 1.0 / nt, dtype=jnp.float32)
        elif len(cfg.target_loss_weights) == len(cfg.target_variables):
            weights = jnp.asarray(cfg.target_loss_weights, dtype=jnp.float32)
        else:
            raise ValueError('Number of weights must be equal to the number of target variables')
        self._target_weights = weights

    def forward(self, prediction: Dict[str, jnp.ndarray],
                data: Dict[str, jnp.ndarray]) -> jnp.ndarray:
        losses = []
        for freq in self._frequencies:
            p = self._predict_last_n[freq]
            if p == 0:
                continue
            freq_suffix = '' if freq == '' else f'_{freq}'
            # Time subsetting (pred[:, -P:, :], gt[:, -P:, :]); kept in native
            # dtype — the cast to f32 happens inside the kernel on load.
            pred = prediction[f'{self._prediction_keys[0]}{freq_suffix}'][:, -p:, :]
            gt = data[f'{self._ground_truth_keys[0]}{freq_suffix}'][:, -p:, :]

            # One fused Pallas launch per frequency: per-target MSE + weighting
            # + sum over targets (equivalent to the per-target loop
            # `loss * weight` and the torch.sum(torch.stack(losses))).
            losses.append(_weighted_mse(pred, gt, self._target_weights))

        if not losses:
            return jnp.zeros((), jnp.float32)
        loss = jnp.sum(jnp.stack(losses))
        for regularization in self._regularization_terms:
            loss = loss + regularization(prediction, data)
        return loss

    def set_regularization_terms(self, regularization_modules):
        self._regularization_terms = regularization_modules

    def __call__(self, prediction, data):
        return self.forward(prediction, data)


# ----------------------------------------------------------------------------
# Pure-JAX reference (mirrors the PyTorch forward loop exactly)
# ----------------------------------------------------------------------------
def reference_loss(pred, gt, weights, predict_last_n):
    pred_s = pred[:, -predict_last_n:, :].astype(jnp.float32)
    gt_s = gt[:, -predict_last_n:, :].astype(jnp.float32)
    losses = []
    for t in range(gt.shape[-1]):
        p = pred_s[:, :, t:t + 1]
        g = gt_s[:, :, t:t + 1]
        losses.append(jnp.mean((p - g) ** 2) * weights[t])
    return jnp.sum(jnp.stack(losses))


if __name__ == "__main__":
    key = jax.random.PRNGKey(0)
    k1, k2, k3, k4 = jax.random.split(key, 4)

    # --- test 1: small shapes through the BaseLoss module --------------------
    batch, seq, num_targets, predict_last_n = 2, 16, 4, 8
    cfg = Config(predict_last_n=predict_last_n,
                 target_variables=[f"t{i}" for i in range(num_targets)],
                 target_loss_weights=None,
                 no_loss_frequencies=())

    y_hat = jax.random.normal(k1, (batch, seq, num_targets), dtype=jnp.float32)
    y = jax.random.normal(k2, (batch, seq, num_targets), dtype=jnp.float32)

    loss_mod = BaseLoss(cfg, prediction_keys=["y_hat"], ground_truth_keys=["y"])
    loss = jax.block_until_ready(loss_mod({"y_hat": y_hat}, {"y": y}))
    ref = reference_loss(y_hat, y, loss_mod._target_weights, predict_last_n)
    assert jnp.allclose(loss, ref, rtol=1e-5, atol=1e-6), (loss, ref)

    # --- test 2: exercise multi-step grid accumulation + tail padding --------
    b2, t2, nt2, p2 = 16, 64, 4, 48
    yh2 = jax.random.normal(k3, (b2, t2, nt2), dtype=jnp.float32)
    y2 = jax.random.normal(k4, (b2, t2, nt2), dtype=jnp.float32)
    w2 = jnp.arange(1, nt2 + 1, dtype=jnp.float32) / nt2
    got2 = jax.block_until_ready(
        _weighted_mse(yh2[:, -p2:, :], y2[:, -p2:, :], w2, max_tile_rows=8))
    ref2 = reference_loss(yh2, y2, w2, p2)
    assert jnp.allclose(got2, ref2, rtol=1e-5, atol=1e-6), (got2, ref2)

    print("KERNEL_OK")
</pallas_src>

<mosaic_0001>
module attributes {stable_mosaic.version = 11 : i64} {
  func.func @_wmse_kernel(%arg0: i32, %arg1: i32, %arg2: memref<8x128xf32, #tpu.memory_space<vmem>>, %arg3: memref<8x128xf32, #tpu.memory_space<vmem>>, %arg4: memref<8x128xf32, #tpu.memory_space<vmem>>, %arg5: memref<8x128xf32, #tpu.memory_space<vmem>>, %arg6: memref<8x128xf32, #tpu.memory_space<vmem>>) attributes {dimension_semantics = [#tpu.dimension_semantics<parallel>, #tpu.dimension_semantics<arbitrary>], iteration_bounds = array<i64: 2, 1>, scalar_prefetch = 0 : i64, scratch_operands = 1 : i64, tpu.core_type = #tpu.core_type<tc>, window_params = [{transform_indices = @transform_0, window_bounds = array<i64: 8, 128>}, {transform_indices = @transform_1, window_bounds = array<i64: 8, 128>}, {pipeline_mode = #tpu.pipeline_mode<synchronous>, transform_indices = @transform_2, window_bounds = array<i64: 8, 128>}, {transform_indices = @transform_3, window_bounds = array<i64: 8, 128>}]} {
    %c0_i32 = arith.constant 0 : i32
    %0 = arith.cmpi eq, %arg1, %c0_i32 : i32
    %1 = arith.extui %0 : i1 to i32
    %c0_i32_0 = arith.constant 0 : i32
    %2 = arith.cmpi ne, %1, %c0_i32_0 : i32
    scf.if %2 {
      %cst_12 = arith.constant 0.000000e+00 : f32
      %17 = vector.broadcast %cst_12 : f32 to vector<8x128xf32>
      %c0_13 = arith.constant 0 : index
      %c0_14 = arith.constant 0 : index
      %18 = vector.load %arg6[%c0_13, %c0_14] : memref<8x128xf32, #tpu.memory_space<vmem>>, vector<8x128xf32>
      tpu.vector_store %arg6[%c0_13, %c0_14], %17 {strides = array<i32>} : memref<8x128xf32, #tpu.memory_space<vmem>>, vector<8x128xf32>,
    } else {
    }
    %c0 = arith.constant 0 : index
    %c0_1 = arith.constant 0 : index
    %3 = vector.load %arg2[%c0, %c0_1] : memref<8x128xf32, #tpu.memory_space<vmem>>, vector<8x128xf32>
    %c0_2 = arith.constant 0 : index
    %c0_3 = arith.constant 0 : index
    %4 = vector.load %arg3[%c0_2, %c0_3] : memref<8x128xf32, #tpu.memory_space<vmem>>, vector<8x128xf32>
    %5 = arith.subf %3, %4 : vector<8x128xf32>
    %6 = arith.mulf %5, %5 : vector<8x128xf32>
    %c0_4 = arith.constant 0 : index
    %c0_5 = arith.constant 0 : index
    %7 = vector.load %arg4[%c0_4, %c0_5] : memref<8x128xf32, #tpu.memory_space<vmem>>, vector<8x128xf32>
    %8 = arith.mulf %6, %7 : vector<8x128xf32>
    %c0_6 = arith.constant 0 : index
    %c0_7 = arith.constant 0 : index
    %9 = vector.load %arg6[%c0_6, %c0_7] : memref<8x128xf32, #tpu.memory_space<vmem>>, vector<8x128xf32>
    %10 = vector.shape_cast %8 : vector<8x128xf32> to vector<1x8x128xf32>
    %cst = arith.constant dense<0.000000e+00> : vector<8x128xf32>
    %11 = vector.multi_reduction <add>, %10, %cst [0] : vector<1x8x128xf32> to vector<8x128xf32>
    %12 = arith.addf %9, %11 : vector<8x128xf32>
    %c0_8 = arith.constant 0 : index
    %c0_9 = arith.constant 0 : index
    %13 = vector.load %arg6[%c0_8, %c0_9] : memref<8x128xf32, #tpu.memory_space<vmem>>, vector<8x128xf32>
    tpu.vector_store %arg6[%c0_8, %c0_9], %12 {strides = array<i32>} : memref<8x128xf32, #tpu.memory_space<vmem>>, vector<8x128xf32>,
    %c0_i32_10 = arith.constant 0 : i32
    %14 = arith.cmpi eq, %arg1, %c0_i32_10 : i32
    %15 = arith.extui %14 : i1 to i32
    %c0_i32_11 = arith.constant 0 : i32
    %16 = arith.cmpi ne, %15, %c0_i32_11 : i32
    scf.if %16 {
      %c0_12 = arith.constant 0 : index
      %c0_13 = arith.constant 0 : index
      %17 = vector.load %arg6[%c0_12, %c0_13] : memref<8x128xf32, #tpu.memory_space<vmem>>, vector<8x128xf32>
      %c0_14 = arith.constant 0 : index
      %c0_15 = arith.constant 0 : index
      %18 = vector.load %arg5[%c0_14, %c0_15] : memref<8x128xf32, #tpu.memory_space<vmem>>, vector<8x128xf32>
      tpu.vector_store %arg5[%c0_14, %c0_15], %17 {strides = array<i32>} : memref<8x128xf32, #tpu.memory_space<vmem>>, vector<8x128xf32>,
    } else {
    }
    return
  }
  func.func @transform_0(%arg0: i32, %arg1: i32) -> (i32, i32) {
    %c1_i32 = arith.constant 1 : i32
    %0 = arith.muli %arg0, %c1_i32 : i32
    %1 = arith.addi %0, %arg1 : i32
    %c0_i32 = arith.constant 0 : i32
    %c0_i32_0 = arith.constant 0 : i32
    return %1, %c0_i32 : i32, i32
  }
  func.func @transform_1(%arg0: i32, %arg1: i32) -> (i32, i32) {
    %c1_i32 = arith.constant 1 : i32
    %0 = arith.muli %arg0, %c1_i32 : i32
    %1 = arith.addi %0, %arg1 : i32
    %c0_i32 = arith.constant 0 : i32
    %c0_i32_0 = arith.constant 0 : i32
    return %1, %c0_i32 : i32, i32
  }
  func.func @transform_2(%arg0: i32, %arg1: i32) -> (i32, i32) {
    %c0_i32 = arith.constant 0 : i32
    %c0_i32_0 = arith.constant 0 : i32
    %c0_i32_1 = arith.constant 0 : i32
    return %c0_i32, %c0_i32_0 : i32, i32
  }
  func.func @transform_3(%arg0: i32, %arg1: i32) -> (i32, i32) {
    %c0_i32 = arith.constant 0 : i32
    %c0_i32_0 = arith.constant 0 : i32
    return %arg0, %c0_i32 : i32, i32
  }
}

</mosaic_0001>

<bundles_post_ra>
// kernel: tpu_custom_call.1
= control target key start
LH: loop header
LB: loop body
LE: loop exit
PB: predicated region body
PF: predicated region fallthrough
CT: control target
= control target key end

     0   :  { %s949_s0 = inlined_call_operand.hbm [shape: f32[16,128], index: 0, kind: input, shape index: {}]   ;;  %s950_s1 = inlined_call_operand.hbm [shape: f32[16,128], index: 1, kind: input, shape index: {}]   ;;  %s951_s2 = inlined_call_operand.hbm [shape: f32[8,128], index: 2, kind: input, shape index: {}]   ;;  %s952_s3 = inlined_call_operand.hbm [shape: f32[16,128], index: 3, kind: output, shape index: {}]  }
   0x1   :  { %958 = sst [smem:[#allocation15_spill]] %s951_s2 }
   0x2   :  { %8 = vsyncpa [#allocation4], 0 }
   0x3   :  { %10 = vsyncpa [#allocation4 + $0x1], 0 }
   0x4   :  { %11 = vsyncpa [#allocation7], 0 }
   0x5   :  { %13 = vsyncpa [#allocation7 + $0x1], 0 }
   0x6   :  { %14 = vsyncpa [#allocation5], 0 }
   0x7   :  { %16 = vsyncpa [#allocation5 + $0x1], 0  ;;  %s701_s12 = smov 0   ;;  %s703_s13 = smov 0  }
   0x8   :  { %s705_s14 = smov 0   ;;  %s707_s15 = smov 0  }
   0x9   :  { %s709_s16 = smov 0   ;;  %s711_s17 = smov 0  }
   0xa LB: > { %s732_s18 = sadd.s32 4294967295, %s675_s17   ;;  %s402_s19 = sadd.s32 4294967294, %s675_s17   ;;  %s675_s17 = sphi %s711_s17, %s22_s17   ;;  %s671_s16 = sphi %s709_s16, %s982_s16   ;;  %s667_s15 = sphi %s707_s15, %s981_s15   ;;  %s663_s14 = sphi %s705_s14, %s980_s14   ;;  %s659_s13 = sphi %s703_s13, %s979_s13   ;;  %s655_s12 = sphi %s701_s12, %s978_s12  }
   0xb   : > { %p56_p0 = scmp.ne.s32.totalorder %s659_s13, %s655_s12  ;;  %p953_p1 = scmp.eq.s32.totalorder %s732_s18, 0 }
   0xc   : > { %p135_p3 = scmp.eq.s32.totalorder %s402_s19, 1  ;;  %p403_p5 = scmp.ge.s32.totalorder %s675_s17, 1 }
   0xd   : > { %p741_p4 = por %p953_p1, %p56_p0  ;;  %p142_p7 = scmp.lt.s32.totalorder %s675_s17, 3 }
   0xe   : > { %p746_p6 = por %p135_p3, %p56_p0  ;;  %s677_s23 = smov [#allocation8]  }
   0xf   : > { %s959_s20 = scalar_select %p741_p4, 1, 0 }
  0x10   : > { %s960_s21 = scalar_select %p746_p6, 1, 0 }
  0x11   : > { %p751_p8 = pnand %p403_p5, %p142_p7  ;;  %s155_s24 = sshll.u32 %s677_s23, 4  ;;  %s156_s24 = int_to_ptr.vmem [resolvable:$true] %s155_s24 }
  0x12   : > { %s34_s26 = sadd.s32 1, %s671_s16  ;;  %s43_s27 = sadd.s32 1, %s663_s14 }
  0x13   : > { %s961_s22 = scalar_select %p751_p8, 1, 0 }
  0x14   : > { %p429_p10 = pneg %p751_p8  ;;  %p766_p12 = scmp.ge.s32.totalorder %s34_s26, 2 }
  0x15   : > { %s964_s2 = sld [smem:[#allocation15_spill]] }
  0x16   : > { %p760_p11 = pnand %p429_p10, %p953_p1 }
  0x17   : > { %s963_s28 = scalar_select %p766_p12, 1, 0 }
  0x18   : > { %p499_p0 = pneg %p760_p11 }
  0x1b   : > { %s497_s4 = scalar_lea.hbm %s964_s2, 128 }
  0x1c   : > { %p498_p13 = scmp.ne.s32.totalorder %s964_s2, %s497_s4  ;;  %p504_p7 = scmp.lt.u32.totalorder %s497_s4, %s964_s2 }
  0x1e   : > { %p500_p3 = pnand %p499_p0, %p498_p13 }
  0x20   : > { %p501_p5 = pneg %p500_p3 }
  0x22   : > { %p506_p10 = pnand %p504_p7, %p501_p5 }
  0x24   : > { %509 = shalt.err (!%p506_p10)
}
  0x25   : > { %s510_s9 = scalar_lea.vmem %s156_s24, 128  ;;  %p518_p6 = scmp.lt.s32.totalorder %s156_s24, %s156_s24 }
  0x26   : > { %p511_p9 = scmp.ne.s32.totalorder %s156_s24, %s510_s9  ;;  %p519_p4 = scmp.lt.s32.totalorder %s510_s9, %s510_s9 }
  0x28   : > { %p513_p1 = pnand %p511_p9, %p499_p0  ;;  %p520_p8 = por %p519_p4, %p518_p6 }
  0x2a   : > { %p514_p2 = pneg %p513_p1 }
  0x2c   : > { %p521_p12 = pnand %p520_p8, %p514_p2 }
  0x2e   : > { %524 = shalt.err (!%p521_p12)
}
  0x2f   : > { %432 = dma.hbm_to_vmem [thread:$0]  (!%p760_p11), %s964_s2, 128, %s156_s24, [#allocation7]  }
  0x30   : > { %p965_p1 = scmp.ne.s32.totalorder %s963_s28, 0  ;;  %p50_p2 = scmp.ne.s32.totalorder %s663_s14, %s659_s13 }
  0x31   : > { %p51_p4 = scmp.eq.s32.totalorder %s675_s17, 0  ;;  %p445_p6 = scmp.lt.s32.totalorder %s675_s17, 2 }
  0x32   : > { %s984_s26 = smov (%p965_p1, %s34_s26), 0  ;;  %p967_p12 = scmp.eq.s32.totalorder %s732_s18, 1 }
  0x33   : > { %966 = sst [smem:[#allocation14_spill]] %s984_s26  ;;  %s40_s19 = ssub.s32 %s671_s16, %s984_s26 }
  0x34   : > { %p41_p8 = scmp.eq.s32.totalorder %s40_s19, 0  ;;  %p52_p9 = por %p51_p4, %p50_p2 }
  0x35   : > { %p798_p13 = por %p967_p12, %p50_p2  ;;  %s166_s25 = sand.u32 1, %s663_s14  }
  0x36   : > { %s806_s29 = scalar_select %p41_p8, %s663_s14, %s43_s27  }
  0x37   : > { %s968_s23 = scalar_select %p798_p13, 1, 0 }
  0x38   : > { %s808_s24 = sshll.u32 %s166_s25, 3  ;;  %s407_s28 = sshll.u32 %s671_s16, 7 }
  0x39   : > { %s814_s5 = scalar_lea.hbm %s949_s0, %s407_s28  ;;  %s170_s6 = scalar_lea.vmem [#allocation3], %s808_s24 }
  0x3a   : > { %s178_s7 = sshll.u32 %s170_s6, 4  ;;  %p819_p11 = pnand %p445_p6, %p52_p9  ;;  %s817_s7 = int_to_ptr.vmem [resolvable:$true] %s178_s7 }
  0x3b   : > { %s826_s10 = scalar_lea.hbm %s950_s1, %s407_s28  ;;  %s185_s11 = sand.u32 1, %s675_s17  }
  0x3c   : > { %s167_s19 = scalar_lea.sflag [#allocation4], %s166_s25  ;;  %s525_s30 = scalar_lea.hbm %s814_s5, 128 }
  0x3d   : > { %p526_p0 = scmp.ne.s32.totalorder %s814_s5, %s525_s30  ;;  %p527_p3 = pneg %p819_p11 }
  0x3e   : > { %s530_s2 = scalar_lea.hbm %s949_s0, 256  ;;  %p531_p10 = scmp.lt.u32.totalorder %s814_s5, %s949_s0 }
  0x3f   : > { %p528_p5 = pnand %p527_p3, %p526_p0  ;;  %p532_p1 = scmp.lt.u32.totalorder %s530_s2, %s525_s30 }
  0x40   : > { %p534_p4 = scmp.lt.u32.totalorder %s525_s30, %s814_s5 }
  0x41   : > { %p529_p7 = pneg %p528_p5  ;;  %p533_p2 = por %p532_p1, %p531_p10 }
  0x43   : > { %p535_p6 = por %p534_p4, %p533_p2 }
  0x45   : > { %p536_p8 = pnand %p535_p6, %p529_p7 }
  0x47   : > { %539 = shalt.err (!%p536_p8)
}
  0x48   : > { %s540_s25 = scalar_lea.vmem %s817_s7, 128  ;;  %s678_s28 = smov [#allocation3]  }
  0x49   : > { %p541_p9 = scmp.ne.s32.totalorder %s817_s7, %s540_s25  ;;  %s545_s9 = sshll.u32 %s678_s28, 4  ;;  %s546_s9 = int_to_ptr.vmem [resolvable:$false] %s545_s9 }
  0x4a   : > { %s547_s26 = scalar_lea.vmem %s546_s9, 256  ;;  %p548_p5 = scmp.lt.s32.totalorder %s817_s7, %s546_s9 }
  0x4b   : > { %p543_p12 = pnand %p541_p9, %p527_p3  ;;  %p549_p10 = scmp.lt.s32.totalorder %s547_s26, %s540_s25 }
  0x4d   : > { %p544_p0 = pneg %p543_p12  ;;  %p550_p1 = por %p549_p10, %p548_p5 }
  0x4f   : > { %p551_p2 = pnand %p550_p1, %p544_p0 }
  0x51   : > { %554 = shalt.err (!%p551_p2)
}
  0x52   : > { %436 = dma.hbm_to_vmem [thread:$0]  (!%p819_p11), %s814_s5, 128, %s817_s7, %s167_s19  }
  0x53   : > { %s189_s2 = scalar_lea.vmem [#allocation6], %s808_s24  ;;  %s186_s4 = scalar_lea.sflag [#allocation7], %s185_s11 }
  0x54   : > { %s197_s30 = sshll.u32 %s189_s2, 4  ;;  %s555_s6 = scalar_lea.hbm %s826_s10, 128  ;;  %s198_s30 = int_to_ptr.vmem [resolvable:$true] %s197_s30 }
  0x55   : > { %p556_p7 = scmp.ne.s32.totalorder %s826_s10, %s555_s6  ;;  %s560_s28 = scalar_lea.hbm %s950_s1, 256 }
  0x56   : > { %p561_p8 = scmp.lt.u32.totalorder %s826_s10, %s950_s1  ;;  %p562_p9 = scmp.lt.u32.totalorder %s560_s28, %s555_s6 }
  0x57   : > { %p558_p4 = pnand %p556_p7, %p527_p3  ;;  %p564_p0 = scmp.lt.u32.totalorder %s555_s6, %s826_s10 }
  0x58   : > { %p563_p12 = por %p562_p9, %p561_p8 }
  0x59   : > { %p559_p6 = pneg %p558_p4 }
  0x5a   : > { %p565_p5 = por %p564_p0, %p563_p12 }
  0x5c   : > { %p566_p10 = pnand %p565_p5, %p559_p6 }
  0x5e   : > { %569 = shalt.err (!%p566_p10)
}
  0x5f   : > { %s570_s24 = scalar_lea.vmem %s198_s30, 128  ;;  %s679_s5 = smov [#allocation6]  }
  0x60   : > { %p571_p1 = scmp.ne.s32.totalorder %s198_s30, %s570_s24  ;;  %s575_s7 = sshll.u32 %s679_s5, 4  ;;  %s576_s7 = int_to_ptr.vmem [resolvable:$false] %s575_s7 }
  0x61   : > { %s577_s11 = scalar_lea.vmem %s576_s7, 256  ;;  %p578_p4 = scmp.lt.s32.totalorder %s198_s30, %s576_s7 }
  0x62   : > { %p573_p2 = pnand %p571_p1, %p527_p3  ;;  %p579_p13 = scmp.lt.s32.totalorder %s577_s11, %s570_s24 }
  0x64   : > { %p574_p7 = pneg %p573_p2  ;;  %p580_p8 = por %p579_p13, %p578_p4 }
  0x66   : > { %p581_p9 = pnand %p580_p8, %p574_p7 }
  0x68   : > { %584 = shalt.err (!%p581_p9)
}
  0x69   : > { %439 = dma.hbm_to_vmem [thread:$0]  (!%p819_p11), %s826_s10, 128, %s198_s30, %s186_s4  }
  0x6a   : > { %p970_p6 = scmp.ne.s32.totalorder %s961_s22, 0 }
  0x6b   : > { %s879_s19 = sand.u32 (!%p970_p6), 1, %s659_s13   ;;  %p971_p3 = scmp.ne.s32.totalorder (!%p970_p6), %s959_s20, 0 }
  0x6c   : > { %206 = sbr.rel (%p970_p6) target bundleno = 148 (0x94), region = 32  ;;  %s411_s2 = sshll.u32 (!%p970_p6), %s879_s19, 3 }
  0x6d   : > { %s209_s6 = scalar_lea.sflag (!%p970_p6), [#allocation4], %s879_s19  ;;  %s212_s8 = scalar_lea.vmem (!%p970_p6), [#allocation3], %s411_s2 }
  0x73   : > { %638 = dma.done.wait (%p971_p3), %s209_s6, 128  }
  0x74   : > { %640 = vsyncadd (%p971_p3), %s209_s6, 4294967168  ;;  %s217_s27 = sand.u32 1, %s732_s18   ;;  %s221_s22 = scalar_lea.vmem [#allocation6], %s411_s2 }
  0x75   : > { %s218_s10 = scalar_lea.sflag [#allocation7], %s217_s27 }
  0x76   : > { %642 = dma.done.wait (%p971_p3), %s218_s10, 128  }
  0x77   : > { %644 = vsyncadd (%p971_p3), %s218_s10, 4294967168  ;;  %p972_p13 = scmp.eq.s32.totalorder %s732_s18, 0 }
  0x79   : > { %646 = dma.done.wait (%p972_p13), [#allocation7], 128   ;;  %p973_p11 = pmov %p972_p13 }
  0x7a   : > { %v260_v0 = vld [vmem:[%s212_s8] sm:$0xff]  ;;  %v261_v1 = vld [vmem:[%s221_s22] sm:$0xff]  ;;  %s252_s30 = scalar_lea.vmem [#allocation9], %s411_s2  ;;  %s416_s25 = sshll.u32 %s667_s15, 7 }
  0x7b   : > { %648 = vsyncadd (%p973_p11), [#allocation7], 4294967168  ;;  %v262_v2 = vsub.f32 %v260_v0, %v261_v1  ;;  %v264_v3 = vld [vmem:[#allocation8] sm:$0xff]  ;;  %s289_s4 = sshll.u32 %s252_s30, 4  ;;  %s902_s18 = scalar_lea.hbm %s952_s3, %s416_s25  ;;  %s897_s4 = int_to_ptr.vmem [resolvable:$true] %s289_s4 }
  0x7c   : > { %s276_s9 = scalar_lea.sflag [#allocation5], %s879_s19  ;;  %s585_s26 = scalar_lea.vmem %s897_s4, 128 }
  0x7d   : > { %v263_v4 = vmul.f32 %v262_v2, %v262_v2  ;;  %p586_p12 = scmp.ne.s32.totalorder %s897_s4, %s585_s26  ;;  %p974_p0 = scmp.ne.s32.totalorder %s968_s23, 0 }
  0x7e   : > { %s680_s15 = smov [#allocation9]  }
  0x7f   : > { %v265_v5 = vmul.f32 %v264_v3, %v263_v4  ;;  %p587_p5 = pnand %p586_p12, %p974_p0  ;;  %s589_s24 = sshll.u32 %s680_s15, 4  ;;  %s590_s24 = int_to_ptr.vmem [resolvable:$false] %s589_s24 }
  0x80   : > { %s591_s5 = scalar_lea.vmem %s590_s24, 256  ;;  %p592_p1 = scmp.lt.s32.totalorder %s897_s4, %s590_s24 }
  0x81   : > { %274 = vst [vmem:[%s252_s30] sm:$0xff] %v265_v5  ;;  %p588_p10 = pneg %p587_p5  ;;  %p593_p2 = scmp.lt.s32.totalorder %s591_s5, %s585_s26 }
  0x83   : > { %p594_p7 = por %p593_p2, %p592_p1 }
  0x85   : > { %p595_p4 = pnand %p594_p7, %p588_p10 }
  0x87   : > { %598 = shalt.err (!%p595_p4)
}
  0x88   : > { %s599_s7 = scalar_lea.hbm %s902_s18, 128  ;;  %s603_s2 = scalar_lea.hbm %s952_s3, 256 }
  0x89   : > { %p600_p8 = scmp.ne.s32.totalorder %s902_s18, %s599_s7  ;;  %p604_p3 = scmp.lt.u32.totalorder %s902_s18, %s952_s3 }
  0x8a   : > { %p605_p13 = scmp.lt.u32.totalorder %s603_s2, %s599_s7  ;;  %p607_p12 = scmp.lt.u32.totalorder %s599_s7, %s902_s18 }
  0x8b   : > { %p601_p9 = pnand %p600_p8, %p974_p0 }
  0x8c   : > { %p606_p11 = por %p605_p13, %p604_p3 }
  0x8d   : > { %p602_p6 = pneg %p601_p9 }
  0x8e   : > { %p608_p5 = por %p607_p12, %p606_p11 }
  0x90   : > { %p609_p10 = pnand %p608_p5, %p602_p6 }
  0x92   : > { %612 = shalt.err (!%p609_p10)
}
  0x93   : > { %427 = dma.vmem_to_hbm [thread:$0]  (%p974_p0), %s897_s4, 128, %s902_s18, %s276_s9  }
  0x94 PF: > { %s301_s27 = sand.u32 1, %s655_s12   ;;  %p975_p1 = scmp.ne.s32.totalorder %s960_s21, 0 }
  0x95   : > { %p976_p2 = scmp.ge.s32.totalorder %s675_s17, 2  ;;  %s302_s10 = scalar_lea.sflag [#allocation5], %s301_s27 }
  0x97   : > { %p441_p7 = pnand %p976_p2, %p975_p1 }
  0x99   : > { %650 = dma.done.wait (!%p441_p7), %s302_s10, 128  }
  0x9a   : > { %652 = vsyncadd (!%p441_p7), %s302_s10, 4294967168  ;;  %s22_s17 = sadd.s32 1, %s675_s17   ;;  %s977_s23 = sld [smem:[#allocation14_spill]] }
  0x9b   : > { %p19_p4 = scmp.ge.s32.totalorder %s22_s17, 4   ;;  %s978_s12 = smov %s659_s13 }
  0x9c   : > { %s979_s13 = smov %s663_s14  ;;  %s980_s14 = smov %s806_s29 }
  0x9d   : > { %s981_s15 = smov %s671_s16  ;;  %21 = sbr.rel (!%p19_p4) target bundleno = 10 (0xa), region = 102 }
  0xa0   : > { %s982_s16 = smov %s977_s23 }
  0xa4   :  { %307 = vsyncpa [#allocation4], 1 }
  0xa5   :  { %309 = vsyncpa [#allocation4 + $0x1], 1 }
  0xa6   :  { %310 = vsyncpa [#allocation7], 1 }
  0xa7   :  { %312 = vsyncpa [#allocation7 + $0x1], 1 }
  0xa8   :  { %313 = vsyncpa [#allocation5], 1 }
  0xa9   :  { %315 = vsyncpa [#allocation5 + $0x1], 1 }

</bundles_post_ra>
